<compile_context>
chip_gen: v7x
topology: tpu7x:2x2x1
jax: 0.10.0
libtpu: 0.0.40
codegen_flags: <defaults>
</compile_context>

<pallas_src>
import jax
import jax.numpy as jnp
from jax import lax
from jax.experimental import pallas as pl
from jax.experimental.pallas import tpu as pltpu

EPS = 1e-12  # matches torch.nn.functional.normalize(p=2, dim=-1) eps


def _round_up(a, b):
    return ((a + b - 1) // b) * b


def _normalize_last(vecs):
    """L2-normalize along the last axis (PyTorch F.normalize semantics)."""
    norm = jnp.sqrt(jnp.sum(vecs * vecs, axis=-1, keepdims=True))
    return vecs / jnp.maximum(norm, EPS)


def _householder_ref(w, vec):
    """Pure-JAX reference helper; w: (..., k), vec broadcastable (..., k)."""
    n = jnp.sqrt(jnp.sum(vec * vec, axis=-1, keepdims=True))
    v = vec / jnp.maximum(n, EPS)
    return w - jnp.sum(v * w, axis=-1, keepdims=True) * v * 2.0


# ---------------------------------------------------------------------------
# Fused kernel: (cached) per-head weight reconstruction + F.linear on x tiles.
# ---------------------------------------------------------------------------
def fused_house_linear_kernel(u_ref, s_ref, ivec_ref, ovec_ref, b_ref,
                              x_ref, vh_hbm_ref, o_ref,
                              w_scr, vh_scr, dma_sem):
    f32 = jnp.float32
    h, y, k = u_ref.shape
    out_f = h * y
    out_pad, in_f = w_scr.shape

    # ---- Reconstruction: runs once, result cached in VMEM for all M-tiles.
    @pl.when(pl.program_id(0) == 0)
    def _reconstruct():
        # Stage Vh HBM -> VMEM once (single-buffered); overlap with the
        # Householder chain below.
        cp = pltpu.make_async_copy(vh_hbm_ref, vh_scr, dma_sem)
        cp.start()

        u = u_ref[...].astype(f32)                            # (h, y, k)
        s = s_ref[...].astype(f32)                            # (h, 1, k)
        # Hoisted, vectorized normalization of all reflection vectors.
        ivec = _normalize_last(ivec_ref[...].astype(f32))     # (h, n_in, k)
        ovec = _normalize_last(ovec_ref[...].astype(f32))     # (h, n_out, k)

        # Sequential Householder reflections as rank-1 VPU updates (cheap:
        # runs once per kernel thanks to the cached-W scratch).
        w = u
        for i in range(ivec_ref.shape[1]):
            vec = ivec[:, i:i + 1, :]                         # (h, 1, k)
            w = w - 2.0 * jnp.sum(vec * w, axis=-1, keepdims=True) * vec
        w = w * s
        for i in range(ovec_ref.shape[1]):
            vec = ovec[:, i:i + 1, :]
            w = w - 2.0 * jnp.sum(vec * w, axis=-1, keepdims=True) * vec

        cp.wait()
        vh = vh_scr[...].astype(f32)                          # (h, k, in_f)
        # Reassociated: (h,y,k) @ (h,k,in_f) directly (no (h,k,in_f) temp).
        w_full = lax.dot_general(
            w, vh,
            dimension_numbers=(((2,), (1,)), ((0,), (0,))),
            preferred_element_type=f32)                       # (h, y, in_f)

        if out_pad > out_f:                                   # zero the lane-pad rows
            w_scr[out_f:out_pad, :] = jnp.zeros(
                (out_pad - out_f, in_f), w_scr.dtype)
        w_scr[0:out_f, :] = w_full.reshape(out_f, in_f).astype(w_scr.dtype)

    # ---- Output GEMM on this M-tile: x @ W.T + bias (MXU dtype = scratch dtype).
    xt = x_ref[...].astype(w_scr.dtype)                       # (tm, in_f)
    acc = lax.dot_general(                                    # contract last dims
        xt, w_scr[...],
        dimension_numbers=(((1,), (1,)), ((), ())),
        preferred_element_type=f32)                           # (tm, out_pad)
    o_ref[...] = (acc + b_ref[...].astype(f32)).astype(o_ref.dtype)


def _pick_row_tile(m):
    # Fixed tile; grid is padded M / tm so awkward M never blows up VMEM.
    return min(256, _round_up(m, 8))


def _vmem_limit_bytes(tm, in_f, out_pad, h, k, y, x_itemsize, out_itemsize,
                      mxu_itemsize, vh_itemsize):
    need = (
        2 * tm * in_f * x_itemsize            # double-buffered x tiles
        + 2 * tm * out_pad * out_itemsize     # double-buffered out tiles
        + out_pad * in_f * mxu_itemsize       # cached W scratch
        + h * k * in_f * vh_itemsize          # Vh staging buffer (single)
        + 4 * h * y * in_f * 4                # recon f32 intermediates (rough)
        + (1 << 20)                           # small constants + slack
    )
    return int(min(100 * 2 ** 20, max(32 * 2 ** 20, 2 * need)))


# ---------------------------------------------------------------------------
# Module wrapper
# ---------------------------------------------------------------------------
def house_multihead_read_linear(x, u, s, v, inside, outside, bias,
                                *, mxu_dtype=None):
    """x: (B, S, in_features) -> (B, S, out_features)."""
    B, S, in_f = x.shape
    h, y, k = u.shape
    out_f = h * y
    M = B * S

    # bf16 MXU path whenever activations are bf16 (review item #1).
    if mxu_dtype is None:
        mxu_dtype = jnp.bfloat16 if x.dtype == jnp.bfloat16 else jnp.float32

    # Zero reflection vectors act as identity (F.normalize(0) == 0), so an
    # empty ParameterList maps to a single zero vector.
    if inside.shape[1] == 0:
        inside = jnp.zeros((h, 1, k), u.dtype)
    if outside.shape[1] == 0:
        outside = jnp.zeros((h, 1, k), u.dtype)
    n_in = inside.shape[1]
    n_out = outside.shape[1]

    out_pad = _round_up(out_f, 128)          # lane-dense output stores
    tm = _pick_row_tile(M)
    m_pad = _round_up(M, tm)
    grid = (m_pad // tm,)

    x2d = x.reshape(M, in_f).astype(mxu_dtype)
    if m_pad != M:
        x2d = jnp.pad(x2d, ((0, m_pad - M), (0, 0)))
    s3 = s.reshape(h, 1, k)
    b2 = jnp.pad(bias.reshape(1, out_f).astype(jnp.float32),
                 ((0, 0), (0, out_pad - out_f)))

    vmem_limit = _vmem_limit_bytes(
        tm, in_f, out_pad, h, k, y,
        jnp.dtype(x2d.dtype).itemsize, jnp.dtype(x.dtype).itemsize,
        jnp.dtype(mxu_dtype).itemsize, jnp.dtype(v.dtype).itemsize)

    out2d = pl.pallas_call(
        fused_house_linear_kernel,
        out_shape=jax.ShapeDtypeStruct((m_pad, out_pad), x.dtype),
        grid=grid,
        in_specs=[
            pl.BlockSpec((h, y, k), lambda m: (0, 0, 0)),        # u
            pl.BlockSpec((h, 1, k), lambda m: (0, 0, 0)),        # s
            pl.BlockSpec((h, n_in, k), lambda m: (0, 0, 0)),     # inside vecs
            pl.BlockSpec((h, n_out, k), lambda m: (0, 0, 0)),    # outside vecs
            pl.BlockSpec((1, out_pad), lambda m: (0, 0)),        # bias (padded)
            pl.BlockSpec((tm, in_f), lambda m: (m, 0)),          # x row-tile
            pl.BlockSpec(memory_space=pl.ANY),                   # Vh stays in HBM
        ],
        out_specs=pl.BlockSpec((tm, out_pad), lambda m: (m, 0)),
        scratch_shapes=[
            pltpu.VMEM((out_pad, in_f), mxu_dtype),              # cached W
            pltpu.VMEM((h, k, in_f), v.dtype),                   # Vh staging
            pltpu.SemaphoreType.DMA,                             # Vh DMA sem
        ],
        compiler_params=pltpu.CompilerParams(
            dimension_semantics=("arbitrary",),   # scratch-cached W -> serial m
            vmem_limit_bytes=vmem_limit),
    )(u, s3, inside, outside, b2, x2d, v)

    return out2d[:M, :out_f].reshape(B, S, out_f)


def reference_forward(x, u, s, v, inside, outside, bias):
    """Pure-JAX reference mirroring the PyTorch `forward` method."""
    w = u
    for i in range(inside.shape[1]):
        w = _householder_ref(w, inside[:, i, None, :])
    w = w * s[:, None, :]
    for i in range(outside.shape[1]):
        w = _householder_ref(w, outside[:, i, None, :])
    W = jnp.einsum('hyk,hkx->hyx', w, v).reshape(-1, v.shape[-1])
    return x @ W.T + bias


if __name__ == "__main__":
    # Small, module-consistent shapes.
    batch, seq = 2, 8
    in_features, out_features = 32, 32
    num_heads = 4
    in_or_left, out_or_right = 2, 2        # number of inside / outside vecs

    y = out_features // num_heads
    k = min(y, in_features)

    key = jax.random.PRNGKey(0)
    k_w, k_b, k_x, k_in, k_out = jax.random.split(key, 5)

    # Deterministic "nn.Linear" parameters (synthetic, no checkpoint).
    linear_weight = jax.random.normal(k_w, (out_features, in_features),
                                      jnp.float32) * 0.1
    bias = jax.random.normal(k_b, (out_features,), jnp.float32) * 0.1

    # Parameter setup (module __init__ glue): per-head SVD of the linear weight.
    # TODO(synk): torch.linalg.svd has no in-kernel Pallas equivalent; done once in plain JAX.
    u, s, v = jnp.linalg.svd(
        linear_weight.reshape(num_heads, y, in_features), full_matrices=False)
    # u: (h, y, k), s: (h, k), v(=Vh): (h, k, x)

    # Householder parameter vectors, shaped (h, n_vecs, k); random so the
    # reflections are non-trivial (forward normalizes them anyway).
    inside = jax.random.normal(k_in, (num_heads, in_or_left, k), jnp.float32)
    outside = jax.random.normal(k_out, (num_heads, out_or_right, k), jnp.float32)

    x = jax.random.normal(k_x, (batch, seq, in_features), jnp.float32)
    ref = reference_forward(x, u, s, v, inside, outside, bias)

    # f32 path (tight check vs. f32 reference).
    out = house_multihead_read_linear(x, u, s, v, inside, outside, bias)
    out = jax.block_until_ready(out)
    assert out.shape == (batch, seq, out_features)
    assert jnp.allclose(out, ref, rtol=1e-4, atol=1e-4), (
        f"f32 max abs err {jnp.max(jnp.abs(out - ref))}")

    # bf16 fast-MXU path (loose check; exercises the production fast path).
    x_bf16 = x.astype(jnp.bfloat16)
    out_bf = house_multihead_read_linear(x_bf16, u, s, v, inside, outside, bias)
    out_bf = jax.block_until_ready(out_bf)
    assert out_bf.shape == (batch, seq, out_features)
    assert jnp.allclose(out_bf.astype(jnp.float32), ref, rtol=5e-2, atol=5e-2), (
        f"bf16 max abs err {jnp.max(jnp.abs(out_bf.astype(jnp.float32) - ref))}")

    print("KERNEL_OK")
</pallas_src>

<mosaic_0001>
module attributes {stable_mosaic.version = 11 : i64} {
  func.func @fused_house_linear_kernel(%arg0: i32, %arg1: memref<4x8x8xf32, #tpu.memory_space<vmem>>, %arg2: memref<4x1x8xf32, #tpu.memory_space<vmem>>, %arg3: memref<4x2x8xf32, #tpu.memory_space<vmem>>, %arg4: memref<4x2x8xf32, #tpu.memory_space<vmem>>, %arg5: memref<1x128xf32, #tpu.memory_space<vmem>>, %arg6: memref<16x32xf32, #tpu.memory_space<vmem>>, %arg7: memref<4x8x32xf32, #tpu.memory_space<any>>, %arg8: memref<16x128xf32, #tpu.memory_space<vmem>>, %arg9: memref<128x32xf32, #tpu.memory_space<vmem>>, %arg10: memref<4x8x32xf32, #tpu.memory_space<vmem>>, %arg11: memref<!tpu.dma_semaphore, #tpu.memory_space<semaphore_mem>>) attributes {dimension_semantics = [#tpu.dimension_semantics<arbitrary>], iteration_bounds = array<i64: 1>, scalar_prefetch = 0 : i64, scratch_operands = 3 : i64, tpu.core_type = #tpu.core_type<tc>, window_params = [{pipeline_mode = #tpu.pipeline_mode<synchronous>, transform_indices = @transform_0, window_bounds = array<i64: 4, 8, 8>}, {pipeline_mode = #tpu.pipeline_mode<synchronous>, transform_indices = @transform_1, window_bounds = array<i64: 4, 1, 8>}, {pipeline_mode = #tpu.pipeline_mode<synchronous>, transform_indices = @transform_2, window_bounds = array<i64: 4, 2, 8>}, {pipeline_mode = #tpu.pipeline_mode<synchronous>, transform_indices = @transform_3, window_bounds = array<i64: 4, 2, 8>}, {pipeline_mode = #tpu.pipeline_mode<synchronous>, transform_indices = @transform_4, window_bounds = array<i64: 1, 128>}, {transform_indices = @transform_5, window_bounds = array<i64: 16, 32>}, {}, {transform_indices = @transform_7, window_bounds = array<i64: 16, 128>}]} {
    %c0_i32 = arith.constant 0 : i32
    %0 = arith.cmpi eq, %arg0, %c0_i32 : i32
    %1 = arith.extui %0 : i1 to i32
    %c0_i32_0 = arith.constant 0 : i32
    %2 = arith.cmpi ne, %1, %c0_i32_0 : i32
    scf.if %2 {
      tpu.enqueue_dma source(%arg7 : memref<4x8x32xf32, #tpu.memory_space<any>>) target(%arg10 : memref<4x8x32xf32, #tpu.memory_space<vmem>>) target_semaphore(%arg11 : memref<!tpu.dma_semaphore, #tpu.memory_space<semaphore_mem>>)
      %c0_8 = arith.constant 0 : index
      %c0_9 = arith.constant 0 : index
      %c0_10 = arith.constant 0 : index
      %10 = vector.load %arg1[%c0_8, %c0_9, %c0_10] : memref<4x8x8xf32, #tpu.memory_space<vmem>>, vector<4x8x8xf32>
      %c0_11 = arith.constant 0 : index
      %c0_12 = arith.constant 0 : index
      %c0_13 = arith.constant 0 : index
      %11 = vector.load %arg2[%c0_11, %c0_12, %c0_13] : memref<4x1x8xf32, #tpu.memory_space<vmem>>, vector<4x1x8xf32>
      %c0_14 = arith.constant 0 : index
      %c0_15 = arith.constant 0 : index
      %c0_16 = arith.constant 0 : index
      %12 = vector.load %arg3[%c0_14, %c0_15, %c0_16] : memref<4x2x8xf32, #tpu.memory_space<vmem>>, vector<4x2x8xf32>
      %13 = arith.mulf %12, %12 : vector<4x2x8xf32>
      %cst_17 = arith.constant dense<0.000000e+00> : vector<4x2xf32>
      %14 = vector.multi_reduction <add>, %13, %cst_17 [2] : vector<4x2x8xf32> to vector<4x2xf32>
      %15 = vector.shape_cast %14 : vector<4x2xf32> to vector<4x2x1xf32>
      %16 = math.sqrt %15 : vector<4x2x1xf32>
      %cst_18 = arith.constant 9.99999996E-13 : f32
      %17 = vector.broadcast %cst_18 : f32 to vector<4x2x1xf32>
      %18 = arith.maximumf %16, %17 : vector<4x2x1xf32>
      %19 = vector.broadcast %18 : vector<4x2x1xf32> to vector<4x2x8xf32>
      %20 = arith.divf %12, %19 : vector<4x2x8xf32>
      %c0_19 = arith.constant 0 : index
      %c0_20 = arith.constant 0 : index
      %c0_21 = arith.constant 0 : index
      %21 = vector.load %arg4[%c0_19, %c0_20, %c0_21] : memref<4x2x8xf32, #tpu.memory_space<vmem>>, vector<4x2x8xf32>
      %22 = arith.mulf %21, %21 : vector<4x2x8xf32>
      %cst_22 = arith.constant dense<0.000000e+00> : vector<4x2xf32>
      %23 = vector.multi_reduction <add>, %22, %cst_22 [2] : vector<4x2x8xf32> to vector<4x2xf32>
      %24 = vector.shape_cast %23 : vector<4x2xf32> to vector<4x2x1xf32>
      %25 = math.sqrt %24 : vector<4x2x1xf32>
      %cst_23 = arith.constant 9.99999996E-13 : f32
      %26 = vector.broadcast %cst_23 : f32 to vector<4x2x1xf32>
      %27 = arith.maximumf %25, %26 : vector<4x2x1xf32>
      %28 = vector.broadcast %27 : vector<4x2x1xf32> to vector<4x2x8xf32>
      %29 = arith.divf %21, %28 : vector<4x2x8xf32>
      %30 = vector.extract_strided_slice %20 {offsets = [0, 0, 0], sizes = [4, 1, 8], strides = [1, 1, 1]} : vector<4x2x8xf32> to vector<4x1x8xf32>
      %31 = vector.broadcast %30 : vector<4x1x8xf32> to vector<4x8x8xf32>
      %32 = arith.mulf %31, %10 : vector<4x8x8xf32>
      %cst_24 = arith.constant dense<0.000000e+00> : vector<4x8xf32>
      %33 = vector.multi_reduction <add>, %32, %cst_24 [2] : vector<4x8x8xf32> to vector<4x8xf32>
      %34 = vector.shape_cast %33 : vector<4x8xf32> to vector<4x8x1xf32>
      %cst_25 = arith.constant 2.000000e+00 : f32
      %35 = vector.broadcast %cst_25 : f32 to vector<4x8x1xf32>
      %36 = arith.mulf %35, %34 : vector<4x8x1xf32>
      %37 = vector.broadcast %36 : vector<4x8x1xf32> to vector<4x8x8xf32>
      %38 = vector.broadcast %30 : vector<4x1x8xf32> to vector<4x8x8xf32>
      %39 = arith.mulf %37, %38 : vector<4x8x8xf32>
      %40 = arith.subf %10, %39 : vector<4x8x8xf32>
      %41 = vector.extract_strided_slice %20 {offsets = [0, 1, 0], sizes = [4, 1, 8], strides = [1, 1, 1]} : vector<4x2x8xf32> to vector<4x1x8xf32>
      %42 = vector.broadcast %41 : vector<4x1x8xf32> to vector<4x8x8xf32>
      %43 = arith.mulf %42, %40 : vector<4x8x8xf32>
      %cst_26 = arith.constant dense<0.000000e+00> : vector<4x8xf32>
      %44 = vector.multi_reduction <add>, %43, %cst_26 [2] : vector<4x8x8xf32> to vector<4x8xf32>
      %45 = vector.shape_cast %44 : vector<4x8xf32> to vector<4x8x1xf32>
      %cst_27 = arith.constant 2.000000e+00 : f32
      %46 = vector.broadcast %cst_27 : f32 to vector<4x8x1xf32>
      %47 = arith.mulf %46, %45 : vector<4x8x1xf32>
      %48 = vector.broadcast %47 : vector<4x8x1xf32> to vector<4x8x8xf32>
      %49 = vector.broadcast %41 : vector<4x1x8xf32> to vector<4x8x8xf32>
      %50 = arith.mulf %48, %49 : vector<4x8x8xf32>
      %51 = arith.subf %40, %50 : vector<4x8x8xf32>
      %52 = vector.broadcast %11 : vector<4x1x8xf32> to vector<4x8x8xf32>
      %53 = arith.mulf %51, %52 : vector<4x8x8xf32>
      %54 = vector.extract_strided_slice %29 {offsets = [0, 0, 0], sizes = [4, 1, 8], strides = [1, 1, 1]} : vector<4x2x8xf32> to vector<4x1x8xf32>
      %55 = vector.broadcast %54 : vector<4x1x8xf32> to vector<4x8x8xf32>
      %56 = arith.mulf %55, %53 : vector<4x8x8xf32>
      %cst_28 = arith.constant dense<0.000000e+00> : vector<4x8xf32>
      %57 = vector.multi_reduction <add>, %56, %cst_28 [2] : vector<4x8x8xf32> to vector<4x8xf32>
      %58 = vector.shape_cast %57 : vector<4x8xf32> to vector<4x8x1xf32>
      %cst_29 = arith.constant 2.000000e+00 : f32
      %59 = vector.broadcast %cst_29 : f32 to vector<4x8x1xf32>
      %60 = arith.mulf %59, %58 : vector<4x8x1xf32>
      %61 = vector.broadcast %60 : vector<4x8x1xf32> to vector<4x8x8xf32>
      %62 = vector.broadcast %54 : vector<4x1x8xf32> to vector<4x8x8xf32>
      %63 = arith.mulf %61, %62 : vector<4x8x8xf32>
      %64 = arith.subf %53, %63 : vector<4x8x8xf32>
      %65 = vector.extract_strided_slice %29 {offsets = [0, 1, 0], sizes = [4, 1, 8], strides = [1, 1, 1]} : vector<4x2x8xf32> to vector<4x1x8xf32>
      %66 = vector.broadcast %65 : vector<4x1x8xf32> to vector<4x8x8xf32>
      %67 = arith.mulf %66, %64 : vector<4x8x8xf32>
      %cst_30 = arith.constant dense<0.000000e+00> : vector<4x8xf32>
      %68 = vector.multi_reduction <add>, %67, %cst_30 [2] : vector<4x8x8xf32> to vector<4x8xf32>
      %69 = vector.shape_cast %68 : vector<4x8xf32> to vector<4x8x1xf32>
      %cst_31 = arith.constant 2.000000e+00 : f32
      %70 = vector.broadcast %cst_31 : f32 to vector<4x8x1xf32>
      %71 = arith.mulf %70, %69 : vector<4x8x1xf32>
      %72 = vector.broadcast %71 : vector<4x8x1xf32> to vector<4x8x8xf32>
      %73 = vector.broadcast %65 : vector<4x1x8xf32> to vector<4x8x8xf32>
      %74 = arith.mulf %72, %73 : vector<4x8x8xf32>
      %75 = arith.subf %64, %74 : vector<4x8x8xf32>
      tpu.wait_dma2 semaphore(%arg11 : memref<!tpu.dma_semaphore, #tpu.memory_space<semaphore_mem>>) src(%arg7 : memref<4x8x32xf32, #tpu.memory_space<any>>) dst(%arg10 : memref<4x8x32xf32, #tpu.memory_space<vmem>>)
      %c0_32 = arith.constant 0 : index
      %c0_33 = arith.constant 0 : index
      %c0_34 = arith.constant 0 : index
      %76 = vector.load %arg10[%c0_32, %c0_33, %c0_34] : memref<4x8x32xf32, #tpu.memory_space<vmem>>, vector<4x8x32xf32>
      %cst_35 = arith.constant dense<0.000000e+00> : vector<4x8x32xf32>
      %77 = tpu.matmul %75, %76, %cst_35 {dimension_numbers = #tpu.dot_dimension_numbers<[2], [1], [1], [2], [0, 0, 0, 1, 1, 2], [0], [0]>} : vector<4x8x8xf32>, vector<4x8x32xf32>, vector<4x8x32xf32> -> vector<4x8x32xf32>
      %cst_36 = arith.constant 0.000000e+00 : f32
      %78 = vector.broadcast %cst_36 : f32 to vector<96x32xf32>
      %c32 = arith.constant 32 : index
      %c0_37 = arith.constant 0 : index
      %79 = vector.load %arg9[%c32, %c0_37] : memref<128x32xf32, #tpu.memory_space<vmem>>, vector<96x32xf32>
      tpu.vector_store %arg9[%c32, %c0_37], %78 {strides = array<i32>} : memref<128x32xf32, #tpu.memory_space<vmem>>, vector<96x32xf32>,
      %80 = vector.shape_cast %77 : vector<4x8x32xf32> to vector<32x32xf32>
      %c0_38 = arith.constant 0 : index
      %c0_39 = arith.constant 0 : index
      %81 = vector.load %arg9[%c0_38, %c0_39] : memref<128x32xf32, #tpu.memory_space<vmem>>, vector<32x32xf32>
      tpu.vector_store %arg9[%c0_38, %c0_39], %80 {strides = array<i32>} : memref<128x32xf32, #tpu.memory_space<vmem>>, vector<32x32xf32>,
    } else {
    }
    %c0 = arith.constant 0 : index
    %c0_1 = arith.constant 0 : index
    %3 = vector.load %arg6[%c0, %c0_1] : memref<16x32xf32, #tpu.memory_space<vmem>>, vector<16x32xf32>
    %c0_2 = arith.constant 0 : index
    %c0_3 = arith.constant 0 : index
    %4 = vector.load %arg9[%c0_2, %c0_3] : memref<128x32xf32, #tpu.memory_space<vmem>>, vector<128x32xf32>
    %cst = arith.constant dense<0.000000e+00> : vector<16x128xf32>
    %5 = tpu.matmul %3, %4, %cst {dimension_numbers = #tpu.dot_dimension_numbers<[1], [1], [0], [0], [0, 0, 1, 0], [], []>} : vector<16x32xf32>, vector<128x32xf32>, vector<16x128xf32> -> vector<16x128xf32>
    %c0_4 = arith.constant 0 : index
    %c0_5 = arith.constant 0 : index
    %6 = vector.load %arg5[%c0_4, %c0_5] : memref<1x128xf32, #tpu.memory_space<vmem>>, vector<1x128xf32>
    %7 = vector.broadcast %6 : vector<1x128xf32> to vector<16x128xf32>
    %8 = arith.addf %5, %7 : vector<16x128xf32>
    %c0_6 = arith.constant 0 : index
    %c0_7 = arith.constant 0 : index
    %9 = vector.load %arg8[%c0_6, %c0_7] : memref<16x128xf32, #tpu.memory_space<vmem>>, vector<16x128xf32>
    tpu.vector_store %arg8[%c0_6, %c0_7], %8 {strides = array<i32>} : memref<16x128xf32, #tpu.memory_space<vmem>>, vector<16x128xf32>,
    return
  }
  func.func @transform_0(%arg0: i32) -> (i32, i32, i32) {
    %c0_i32 = arith.constant 0 : i32
    %c0_i32_0 = arith.constant 0 : i32
    %c0_i32_1 = arith.constant 0 : i32
    %c0_i32_2 = arith.constant 0 : i32
    return %c0_i32, %c0_i32_0, %c0_i32_1 : i32, i32, i32
  }
  func.func @transform_1(%arg0: i32) -> (i32, i32, i32) {
    %c0_i32 = arith.constant 0 : i32
    %c0_i32_0 = arith.constant 0 : i32
    %c0_i32_1 = arith.constant 0 : i32
    %c0_i32_2 = arith.constant 0 : i32
    return %c0_i32, %c0_i32_0, %c0_i32_1 : i32, i32, i32
  }
  func.func @transform_2(%arg0: i32) -> (i32, i32, i32) {
    %c0_i32 = arith.constant 0 : i32
    %c0_i32_0 = arith.constant 0 : i32
    %c0_i32_1 = arith.constant 0 : i32
    %c0_i32_2 = arith.constant 0 : i32
    return %c0_i32, %c0_i32_0, %c0_i32_1 : i32, i32, i32
  }
  func.func @transform_3(%arg0: i32) -> (i32, i32, i32) {
    %c0_i32 = arith.constant 0 : i32
    %c0_i32_0 = arith.constant 0 : i32
    %c0_i32_1 = arith.constant 0 : i32
    %c0_i32_2 = arith.constant 0 : i32
    return %c0_i32, %c0_i32_0, %c0_i32_1 : i32, i32, i32
  }
  func.func @transform_4(%arg0: i32) -> (i32, i32) {
    %c0_i32 = arith.constant 0 : i32
    %c0_i32_0 = arith.constant 0 : i32
    %c0_i32_1 = arith.constant 0 : i32
    return %c0_i32, %c0_i32_0 : i32, i32
  }
  func.func @transform_5(%arg0: i32) -> (i32, i32) {
    %c0_i32 = arith.constant 0 : i32
    %c0_i32_0 = arith.constant 0 : i32
    return %arg0, %c0_i32 : i32, i32
  }
  func.func @transform_7(%arg0: i32) -> (i32, i32) {
    %c0_i32 = arith.constant 0 : i32
    %c0_i32_0 = arith.constant 0 : i32
    return %arg0, %c0_i32 : i32, i32
  }
}

</mosaic_0001>

<bundles_post_ra>
// kernel: tpu_custom_call.1
= control target key start
LH: loop header
LB: loop body
LE: loop exit
PB: predicated region body
PF: predicated region fallthrough
CT: control target
= control target key end

     0   :  { %12 = vsyncpa [#allocation6], 0  ;;  %s1610_s0 = inlined_call_operand.hbm [shape: f32[4,8,8], index: 0, kind: input, shape index: {}]   ;;  %s1611_s1 = inlined_call_operand.hbm [shape: f32[4,1,8], index: 1, kind: input, shape index: {}]   ;;  %s1612_s2 = inlined_call_operand.hbm [shape: f32[4,2,8], index: 2, kind: input, shape index: {}]   ;;  %s1613_s3 = inlined_call_operand.hbm [shape: f32[4,2,8], index: 3, kind: input, shape index: {}]   ;;  %s1614_s4 = inlined_call_operand.vmem [shape: f32[1,128], index: 4, kind: input, shape index: {}]   ;;  %s1615_s5 = inlined_call_operand.vmem [shape: f32[16,32], index: 5, kind: input, shape index: {}]   ;;  %s1616_s6 = inlined_call_operand.hbm [shape: f32[4,8,32], index: 6, kind: input, shape index: {}]   ;;  %s1617_s7 = inlined_call_operand.hbm [shape: f32[16,128], index: 7, kind: output, shape index: {}]  }
   0x1   :  { %13 = vsyncpa [#allocation9], 0 }
   0x2   :  { %14 = vsyncpa [#allocation12], 0 }
   0x3   :  { %15 = vsyncpa [#allocation7], 0  ;;  %s1273_s24 = smov [#allocation8]   ;;  %s1131_s28 = scalar_lea.hbm %s1611_s1, 64 }
   0x4   :  { %s33_s25 = sshll.u32 %s1273_s24, 4  ;;  %p1132_p0 = scmp.ne.s32.totalorder %s1611_s1, %s1131_s28  ;;  %s34_s25 = int_to_ptr.vmem [resolvable:$true] %s33_s25 }
   0x5   :  { %p1135_p1 = scmp.lt.u32.totalorder %s1131_s28, %s1611_s1 }
   0x7   :  { %p1137_p2 = pnand %p1135_p1, %p1132_p0 }
   0x9   :  { %1140 = shalt.err (!%p1137_p2)
}
   0xa   :  { %s1141_s10 = scalar_lea.vmem %s34_s25, 64  ;;  %p1146_p4 = scmp.lt.s32.totalorder %s34_s25, %s34_s25 }
   0xb   :  { %p1142_p3 = scmp.ne.s32.totalorder %s34_s25, %s1141_s10  ;;  %p1147_p5 = scmp.lt.s32.totalorder %s1141_s10, %s1141_s10 }
   0xd   :  { %p1148_p6 = por %p1147_p5, %p1146_p4 }
   0xf   :  { %p1149_p7 = pnand %p1148_p6, %p1142_p3 }
  0x11   :  { %1152 = shalt.err (!%p1149_p7)
}
  0x12   :  { %s1274_s11 = smov 16   ;;  %s1275_s12 = smov 1  }
  0x13   :  { %39 = dma.hbm_to_vmem [thread:$0]  %s1611_s1, 64, %s34_s25, [#allocation9], %s1274_s11, %s1274_s11, %s1275_s12  }
  0x14   :  { %s1276_s15 = smov [#allocation5]   ;;  %s1153_s19 = scalar_lea.hbm %s1610_s0, 512 }
  0x15   :  { %s21_s16 = sshll.u32 %s1276_s15, 4  ;;  %p1154_p8 = scmp.ne.s32.totalorder %s1610_s0, %s1153_s19  ;;  %s22_s16 = int_to_ptr.vmem [resolvable:$true] %s21_s16 }
  0x16   :  { %p1157_p9 = scmp.lt.u32.totalorder %s1153_s19, %s1610_s0 }
  0x18   :  { %p1159_p10 = pnand %p1157_p9, %p1154_p8 }
  0x1a   :  { %1162 = shalt.err (!%p1159_p10)
}
  0x1b   :  { %s1163_s24 = scalar_lea.vmem %s22_s16, 512  ;;  %p1168_p12 = scmp.lt.s32.totalorder %s22_s16, %s22_s16 }
  0x1c   :  { %p1164_p11 = scmp.ne.s32.totalorder %s22_s16, %s1163_s24  ;;  %p1169_p13 = scmp.lt.s32.totalorder %s1163_s24, %s1163_s24 }
  0x1e   :  { %p1170_p0 = por %p1169_p13, %p1168_p12 }
  0x20   :  { %p1171_p1 = pnand %p1170_p0, %p1164_p11 }
  0x22   :  { %1174 = shalt.err (!%p1171_p1)
}
  0x23   :  { %s1277_s1 = smov 128   ;;  %s1278_s25 = smov 8  }
  0x24   :  { %27 = dma.hbm_to_vmem [thread:$0]  %s1610_s0, 512, %s22_s16, [#allocation6], %s1277_s1, %s1277_s1, %s1278_s25  }
  0x25   :  { %s1279_s28 = smov [#allocation10]   ;;  %s1175_s9 = scalar_lea.hbm %s1612_s2, 128 }
  0x26   :  { %s45_s29 = sshll.u32 %s1279_s28, 4  ;;  %p1176_p2 = scmp.ne.s32.totalorder %s1612_s2, %s1175_s9  ;;  %s46_s29 = int_to_ptr.vmem [resolvable:$true] %s45_s29 }
  0x27   :  { %p1179_p3 = scmp.lt.u32.totalorder %s1175_s9, %s1612_s2 }
  0x29   :  { %p1181_p4 = pnand %p1179_p3, %p1176_p2 }
  0x2b   :  { %1184 = shalt.err (!%p1181_p4)
}
  0x2c   :  { %s1185_s14 = scalar_lea.vmem %s46_s29, 128  ;;  %p1190_p6 = scmp.lt.s32.totalorder %s46_s29, %s46_s29 }
  0x2d   :  { %p1186_p5 = scmp.ne.s32.totalorder %s46_s29, %s1185_s14  ;;  %p1191_p7 = scmp.lt.s32.totalorder %s1185_s14, %s1185_s14 }
  0x2f   :  { %p1192_p8 = por %p1191_p7, %p1190_p6 }
  0x31   :  { %p1193_p9 = pnand %p1192_p8, %p1186_p5 }
  0x33   :  { %1196 = shalt.err (!%p1193_p9)
}
  0x34   :  { %s1280_s0 = smov 32   ;;  %s1281_s15 = smov 2  }
  0x35   :  { %51 = dma.hbm_to_vmem [thread:$0]  %s1612_s2, 128, %s46_s29, [#allocation9], %s1280_s0, %s1280_s0, %s1281_s15  }
  0x36   :  { %s1282_s18 = smov [#allocation11]   ;;  %s1197_s22 = scalar_lea.hbm %s1613_s3, 128 }
  0x37   :  { %s57_s19 = sshll.u32 %s1282_s18, 4  ;;  %p1198_p10 = scmp.ne.s32.totalorder %s1613_s3, %s1197_s22  ;;  %s58_s19 = int_to_ptr.vmem [resolvable:$true] %s57_s19 }
  0x38   :  { %p1201_p11 = scmp.lt.u32.totalorder %s1197_s22, %s1613_s3 }
  0x3a   :  { %p1203_p12 = pnand %p1201_p11, %p1198_p10 }
  0x3c   :  { %1206 = shalt.err (!%p1203_p12)
}
  0x3d   :  { %s1207_s28 = scalar_lea.vmem %s58_s19, 128  ;;  %p1212_p0 = scmp.lt.s32.totalorder %s58_s19, %s58_s19 }
  0x3e   :  { %p1208_p13 = scmp.ne.s32.totalorder %s58_s19, %s1207_s28  ;;  %p1213_p1 = scmp.lt.s32.totalorder %s1207_s28, %s1207_s28 }
  0x40   :  { %p1214_p2 = por %p1213_p1, %p1212_p0 }
  0x42   :  { %p1215_p3 = pnand %p1214_p2, %p1208_p13 }
  0x44   :  { %1218 = shalt.err (!%p1215_p3)
}
  0x45   :  { %63 = dma.hbm_to_vmem [thread:$0]  %s1613_s3, 128, %s58_s19, [#allocation12], %s1280_s0, %s1280_s0, %s1281_s15  }
  0x46   :  { %1263 = dma.done.wait [#allocation6], 512  }
  0x47   :  { %1264 = vsyncadd [#allocation6], 4294966784 }
  0x48   :  { %1265 = dma.done.wait [#allocation9], 192  }
  0x49   :  { %1266 = vsyncadd [#allocation9], 4294967104 }
  0x4a   :  { %1267 = dma.done.wait [#allocation12], 128  }
  0x4b   :  { %1268 = vsyncadd [#allocation12], 4294967168  ;;  %vm111_vm0 = vcmask 58368   ;;  %v1378_v0 = vld [vmem:[#allocation10 + $0x4] sm:$0x3]  ;;  %v224_v39 = vlaneseq  ;;  %v95_v47 = vld [vmem:[#allocation5] sm:$0xff] }
  0x4c   :  { %v1380_v1 = vld [vmem:[#allocation10] sm:$0x3]  ;;  %v1382_v2 = vld [vmem:[#allocation10 + $0x6] sm:$0x3]  ;;  %v109_v3 = vmul.f32 %v1378_v0, %v1378_v0  ;;  %v1390_v6 = vld [vmem:[#allocation10 + $0x2] sm:$0x3] }
  0x4d   :  { %v107_v4 = vmul.f32 %v1380_v1, %v1380_v1  ;;  %v110_v5 = vmul.f32 %v1382_v2, %v1382_v2  ;;  %v108_v7 = vmul.f32 %v1390_v6, %v1390_v6  ;;  %v225_v41 = vshrl.u32 %v224_v39, 7  ;;  %v97_v52 = vld [vmem:[#allocation5 + $0x10] sm:$0xff]  ;;  %v96_v56 = vld [vmem:[#allocation5 + $0x8] sm:$0xff]  ;;  %v98_v62 = vld [vmem:[#allocation5 + $0x18] sm:$0xff]  ;;  %s1283_s3 = smov [#allocation3]   ;;  %s1219_s10 = scalar_lea.hbm %s1616_s6, 512 }
  0x4e   :  { %v118_v8 = vsel %vm111_vm0, %v109_v3, 0.0  ;;  %vm244_vm9 = vcmask 64512   ;;  %v1406_v57 = vld [vmem:[#allocation11] sm:$0x3]  ;;  %s91_s30 = sshll.u32 %s1283_s3, 4  ;;  %p1220_p4 = scmp.ne.s32.totalorder %s1616_s6, %s1219_s10  ;;  %s92_s30 = int_to_ptr.vmem [resolvable:$true] %s91_s30 }
  0x4f   :  { %v112_v9 = vsel %vm111_vm0, %v107_v4, 0.0  ;;  %119 = vadd.xlane.f32.xlu1 %v118_v8  ;;  %v121_v10 = vsel %vm111_vm0, %v110_v5, 0.0  ;;  %v115_v11 = vsel %vm111_vm0, %v108_v7, 0.0  ;;  %v1398_v43 = vsub.s32 0, %v225_v41  ;;  %p1223_p5 = scmp.lt.u32.totalorder %s1219_s10, %s1616_s6 }
  0x50   :  { %113 = vadd.xlane.f32.xlu0 %v112_v9  ;;  %v1424_v9 = vld [vmem:[#allocation11 + $0x6] sm:$0x3] }
  0x51   :  { %p1225_p6 = pnand %p1223_p5, %p1220_p4 }
  0x53   :  { %122 = vadd.xlane.f32.xlu1 %v121_v10 }
  0x54   :  { %116 = vadd.xlane.f32.xlu0 %v115_v11 }
  0xdc   :  { %v120_v12 = vpop.xlane.xlu1 %119 }
  0xdd   :  { %v114_v13 = vpop.xlane.xlu0 %113  ;;  %1099 = vrsqrt.f32 %v120_v12  ;;  %vm140_vm1 = vcmp.eq.f32.partialorder %v120_v12, inf  ;;  %v143_v19 = vand.u32 2147483648, %v120_v12  ;;  %vm142_vm2 = vcmp.eq.f32.partialorder %v120_v12, 0.0 }
  0xde   :  { %1101 = vrsqrt.f32 %v114_v13  ;;  %vm126_vm3 = vcmp.eq.f32.partialorder %v114_v13, inf  ;;  %v129_v22 = vand.u32 2147483648, %v114_v13  ;;  %vm128_vm4 = vcmp.eq.f32.partialorder %v114_v13, 0.0 }
  0xe0   :  { %v123_v14 = vpop.xlane.xlu1 %122 }
  0xe1   :  { %v117_v15 = vpop.xlane.xlu0 %116  ;;  %1103 = vrsqrt.f32 %v123_v14  ;;  %vm147_vm5 = vcmp.eq.f32.partialorder %v123_v14, inf  ;;  %vm149_vm6 = vcmp.eq.f32.partialorder %v123_v14, 0.0  ;;  %v150_v31 = vand.u32 2147483648, %v123_v14 }
  0xe2   :  { %1105 = vrsqrt.f32 %v117_v15  ;;  %vm133_vm7 = vcmp.eq.f32.partialorder %v117_v15, inf  ;;  %v136_v34 = vand.u32 2147483648, %v117_v15  ;;  %vm135_vm8 = vcmp.eq.f32.partialorder %v117_v15, 0.0 }
  0xe7   :  { %v1100_v16 = vpop.eup %1099 }
  0xe8   :  { %v1102_v17 = vpop.eup %1101  ;;  %v139_v18 = vmul.f32 %v1100_v16, %v120_v12 }
  0xe9   :  { %v125_v20 = vmul.f32 %v1102_v17, %v114_v13  ;;  %v1432_v17 = vsub.s32 1, %v225_v41 }
  0xea   :  { %v141_v21 = vsel %vm140_vm1, %v120_v12, %v139_v18  ;;  %v171_v12 = vmul.f32 %v1424_v9, %v1424_v9 }
  0xeb   :  { %v1104_v23 = vpop.eup %1103  ;;  %v144_v24 = vsel %vm142_vm2, %v143_v19, %v141_v21  ;;  %v127_v25 = vsel %vm126_vm3, %v114_v13, %v125_v20 }
  0xec   :  { %v1106_v26 = vpop.eup %1105  ;;  %v154_v27 = vmax.f32 %v144_v24, 1e-12  ;;  %v130_v28 = vsel %vm128_vm4, %v129_v22, %v127_v25  ;;  %v146_v29 = vmul.f32 %v1104_v23, %v123_v14 }
  0xed   :  { %v152_v30 = vmax.f32 %v130_v28, 1e-12  ;;  %v132_v32 = vmul.f32 %v1106_v26, %v117_v15 }
  0xee   :  { %1107 = vrcp.f32 %v154_v27  ;;  %v148_v33 = vsel %vm147_vm5, %v123_v14, %v146_v29  ;;  %v181_v14 = vsel %vm111_vm0, %v171_v12, 0.0 }
  0xef   :  { %1109 = vrcp.f32 %v152_v30  ;;  %v151_v35 = vsel %vm149_vm6, %v150_v31, %v148_v33  ;;  %v134_v36 = vsel %vm133_vm7, %v117_v15, %v132_v32 }
  0xf0   :  { %v155_v37 = vmax.f32 %v151_v35, 1e-12  ;;  %v137_v38 = vsel %vm135_vm8, %v136_v34, %v134_v36 }
  0xf1   :  { %v153_v40 = vmax.f32 %v137_v38, 1e-12 }
  0xf2   :  { %1111 = vrcp.f32 %v155_v37 }
  0xf3   :  { %1113 = vrcp.f32 %v153_v40 }
  0xf8   :  { %v1108_v42 = vpop.eup %1107 }
  0xf9   :  { %v1110_v44 = vpop.eup %1109  ;;  %v161_v45 = vmul.f32 %v1108_v42, %v1378_v0  ;;  %v168_v0 = vmul.f32 %v1406_v57, %v1406_v57 }
  0xfa   :  { %v157_v46 = vmul.f32 %v1110_v44, %v1380_v1  ;;  %v1413_v1 = vld [vmem:[#allocation11 + $0x2] sm:$0x3] }
  0xfb   :  { %v235_v50 = vrot.slane %v161_v45, %v1398_v43  ;;  %v172_v7 = vsel %vm111_vm0, %v168_v0, 0.0  ;;  %v1445_v30 = vrot.slane %v161_v45, %v1432_v17 }
  0xfc   :  { %v1112_v48 = vpop.eup %1111  ;;  %v227_v49 = vrot.slane %v157_v46, %v1398_v43  ;;  %v1437_v24 = vrot.slane %v157_v46, %v1432_v17 }
  0xfd   :  { %v1114_v51 = vpop.eup %1113  ;;  %v163_v53 = vmul.f32 %v1112_v48, %v1382_v2  ;;  %v242_v60 = vmul.f32 %v235_v50, %v97_v52  ;;  %v1415_v2 = vld [vmem:[#allocation11 + $0x4] sm:$0x3] }
  0xfe   :  { %v240_v54 = vmul.f32 %v227_v49, %v95_v47  ;;  %v159_v55 = vmul.f32 %v1114_v51, %v1390_v6  ;;  %v169_v6 = vmul.f32 %v1413_v1, %v1413_v1  ;;  %v170_v8 = vmul.f32 %v1415_v2, %v1415_v2 }
  0xff   :  { %v239_v61 = vrot.slane %v163_v53, %v1398_v43  ;;  %v251_v4 = vsel %vm244_vm9, %v242_v60, 0.0  ;;  %v1461_v41 = vrot.slane %v163_v53, %v1432_v17 }
 0x100   :  { %v245_v58 = vsel %vm244_vm9, %v240_v54, 0.0  ;;  %v231_v59 = vrot.slane %v159_v55, %v1398_v43  ;;  %v175_v11 = vsel %vm111_vm0, %v169_v6, 0.0  ;;  %v178_v13 = vsel %vm111_vm0, %v170_v8, 0.0 }
 0x101   :  { %246 = vadd.xlane.f32.xlu0 %v245_v58  ;;  %v243_v5 = vmul.f32 %v239_v61, %v98_v62  ;;  %v1442_v29 = vrot.slane %v159_v55, %v1432_v17 }
 0x102   :  { %v241_v63 = vmul.f32 %v231_v59, %v96_v56 }
 0x103   :  { %v254_v10 = vsel %vm244_vm9, %v243_v5, 0.0 }
 0x104   :  { %v248_v3 = vsel %vm244_vm9, %v241_v63, 0.0 }
 0x105   :  { %249 = vadd.xlane.f32.xlu1 %v248_v3  ;;  %252 = vadd.xlane.f32.xlu0 %v251_v4 }
 0x109   :  { %255 = vadd.xlane.f32.xlu1 %v254_v10  ;;  %173 = vadd.xlane.f32.xlu0 %v172_v7 }
 0x10d   :  { %176 = vadd.xlane.f32.xlu1 %v175_v11  ;;  %179 = vadd.xlane.f32.xlu0 %v178_v13 }
 0x111   :  { %182 = vadd.xlane.f32.xlu1 %v181_v14 }
 0x18e   :  { %v247_v15 = vpop.xlane.xlu0 %246 }
 0x18f   :  { %v257_v16 = vmul.f32 2.0, %v247_v15 }
 0x191   :  { %v261_v18 = vmul.f32 %v257_v16, %v227_v49 }
 0x192   :  { %v250_v19 = vpop.xlane.xlu1 %249  ;;  %v253_v20 = vpop.xlane.xlu0 %252 }
 0x193   :  { %v258_v21 = vmul.f32 2.0, %v250_v19  ;;  %v259_v22 = vmul.f32 2.0, %v253_v20  ;;  %v1434_v23 = vsub.f32 %v95_v47, %v261_v18 }
 0x195   :  { %v262_v25 = vmul.f32 %v258_v21, %v231_v59  ;;  %v263_v26 = vmul.f32 %v259_v22, %v235_v50  ;;  %v285_v27 = vmul.f32 %v1437_v24, %v1434_v23 }
 0x196   :  { %v256_v28 = vpop.xlane.xlu1 %255  ;;  %v174_v45 = vpop.xlane.xlu0 %173 }
 0x197   :  { %v260_v31 = vmul.f32 2.0, %v256_v28  ;;  %v289_v32 = vsel %vm244_vm9, %v285_v27, 0.0  ;;  %v1448_v33 = vsub.f32 %v96_v56, %v262_v25  ;;  %v1450_v34 = vsub.f32 %v97_v52, %v263_v26  ;;  %v928_v25 = vld [vmem:[#allocation8] ss:$0 sm:$0xff] }
 0x198   :  { %290 = vadd.xlane.f32.xlu0 %v289_v32  ;;  %1115 = vrsqrt.f32 %v174_v45  ;;  %vm186_vm10 = vcmp.eq.f32.partialorder %v174_v45, inf  ;;  %v189_v54 = vand.u32 2147483648, %v174_v45  ;;  %vm188_vm12 = vcmp.eq.f32.partialorder %v174_v45, 0.0 }
 0x199   :  { %v264_v35 = vmul.f32 %v260_v31, %v239_v61  ;;  %v286_v36 = vmul.f32 %v1442_v29, %v1448_v33  ;;  %v287_v37 = vmul.f32 %v1445_v30, %v1450_v34 }
 0x19a   :  { %v177_v46 = vpop.xlane.xlu1 %176  ;;  %v180_v47 = vpop.xlane.xlu0 %179 }
 0x19b   :  { %v292_v38 = vsel %vm244_vm9, %v286_v36, 0.0  ;;  %v295_v39 = vsel %vm244_vm9, %v287_v37, 0.0  ;;  %v1458_v40 = vsub.f32 %v98_v62, %v264_v35  ;;  %1117 = vrsqrt.f32 %v177_v46 }
 0x19c   :  { %293 = vadd.xlane.f32.xlu1 %v292_v38  ;;  %296 = vadd.xlane.f32.xlu0 %v295_v39  ;;  %1119 = vrsqrt.f32 %v180_v47  ;;  %vm193_vm11 = vcmp.eq.f32.partialorder %v177_v46, inf  ;;  %vm200_vm13 = vcmp.eq.f32.partialorder %v180_v47, inf  ;;  %v196_v59 = vand.u32 2147483648, %v177_v46  ;;  %v929_v39 = vld [vmem:[#allocation8 + $0x1] ss:$0 sm:$0xff] }
 0x19d   :  { %v288_v42 = vmul.f32 %v1461_v41, %v1458_v40  ;;  %vm195_vm14 = vcmp.eq.f32.partialorder %v177_v46, 0.0  ;;  %v203_v61 = vand.u32 2147483648, %v180_v47  ;;  %vm202_vm15 = vcmp.eq.f32.partialorder %v180_v47, 0.0 }
 0x19e   :  { %v183_v48 = vpop.xlane.xlu1 %182 }
 0x19f   :  { %v298_v44 = vsel %vm244_vm9, %v288_v42, 0.0  ;;  %1121 = vrsqrt.f32 %v183_v48  ;;  %vm207_vm0 = vcmp.eq.f32.partialorder %v183_v48, inf  ;;  %v210_v5 = vand.u32 2147483648, %v183_v48  ;;  %v930_v42 = vld [vmem:[#allocation8 + $0x2] ss:$0 sm:$0xff] }
 0x1a0   :  { %299 = vadd.xlane.f32.xlu1 %v298_v44  ;;  %vm209_vm1 = vcmp.eq.f32.partialorder %v183_v48, 0.0 }
 0x1a2   :  { %v1116_v49 = vpop.eup %1115 }
 0x1a3   :  { %v185_v52 = vmul.f32 %v1116_v49, %v174_v45 }
 0x1a5   :  { %v1118_v50 = vpop.eup %1117  ;;  %v187_v58 = vsel %vm186_vm10, %v174_v45, %v185_v52 }
 0x1a6   :  { %v1120_v51 = vpop.eup %1119  ;;  %v192_v53 = vmul.f32 %v1118_v50, %v177_v46  ;;  %v190_v62 = vsel %vm188_vm12, %v189_v54, %v187_v58  ;;  %v931_v50 = vld [vmem:[#allocation8 + $0x3] ss:$0 sm:$0xff] }
 0x1a7   :  { %v199_v55 = vmul.f32 %v1120_v51, %v180_v47  ;;  %v212_v4 = vmax.f32 %v190_v62, 1e-12 }
 0x1a8   :  { %v194_v60 = vsel %vm193_vm11, %v177_v46, %v192_v53 }
 0x1a9   :  { %v1122_v56 = vpop.eup %1121  ;;  %v201_v0 = vsel %vm200_vm13, %v180_v47, %v199_v55  ;;  %v197_v3 = vsel %vm195_vm14, %v196_v59, %v194_v60  ;;  %1123 = vrcp.f32 %v212_v4 }
 0x1aa   :  { %v206_v63 = vmul.f32 %v1122_v56, %v183_v48  ;;  %v204_v6 = vsel %vm202_vm15, %v203_v61, %v201_v0  ;;  %v213_v8 = vmax.f32 %v197_v3, 1e-12 }
 0x1ab   :  { %v214_v10 = vmax.f32 %v204_v6, 1e-12 }
 0x1ac   :  { %v208_v7 = vsel %vm207_vm0, %v183_v48, %v206_v63  ;;  %1125 = vrcp.f32 %v213_v8 }
 0x1ad   :  { %v211_v11 = vsel %vm209_vm1, %v210_v5, %v208_v7  ;;  %1127 = vrcp.f32 %v214_v10 }
 0x1ae   :  { %v215_v12 = vmax.f32 %v211_v11, 1e-12 }
 0x1b0   :  { %1129 = vrcp.f32 %v215_v12 }
 0x1b3   :  { %v1124_v13 = vpop.eup %1123 }
 0x1b4   :  { %v217_v20 = vmul.f32 %v1124_v13, %v1406_v57 }
 0x1b6   :  { %v1126_v16 = vpop.eup %1125  ;;  %v388_v0 = vrot.slane %v217_v20, %v1432_v17 }
 0x1b7   :  { %v1128_v18 = vpop.eup %1127  ;;  %v219_v31 = vmul.f32 %v1126_v16, %v1413_v1 }
 0x1b8   :  { %v221_v32 = vmul.f32 %v1128_v18, %v1415_v2 }
 0x1b9   :  { %v348_v1 = vrot.slane %v219_v31, %v1398_v43  ;;  %v392_v6 = vrot.slane %v219_v31, %v1432_v17 }
 0x1ba   :  { %v1130_v35 = vpop.eup %1129  ;;  %v352_v2 = vrot.slane %v221_v32, %v1398_v43  ;;  %v396_v7 = vrot.slane %v221_v32, %v1432_v17 }
 0x225   :  { %v291_v14 = vpop.xlane.xlu0 %290 }
 0x226   :  { %v301_v15 = vmul.f32 2.0, %v291_v14 }
 0x228   :  { %v305_v19 = vmul.f32 %v301_v15, %v1437_v24  ;;  %v344_v24 = vrot.slane %v217_v20, %v1398_v43 }
 0x229   :  { %v294_v21 = vpop.xlane.xlu1 %293  ;;  %v297_v22 = vpop.xlane.xlu0 %296 }
 0x22a   :  { %v309_v26 = vsub.f32 %v1434_v23, %v305_v19  ;;  %v302_v27 = vmul.f32 2.0, %v294_v21  ;;  %v303_v28 = vmul.f32 2.0, %v297_v22 }
 0x22c   :  { %v306_v36 = vmul.f32 %v302_v27, %v1442_v29  ;;  %v307_v37 = vmul.f32 %v303_v28, %v1445_v30  ;;  %v337_v38 = vmul.f32 %v928_v25, %v309_v26  ;;  %v223_v29 = vmul.f32 %v1130_v35, %v1424_v9 }
 0x22d   :  { %v300_v57 = vpop.xlane.xlu1 %299 }
 0x22e   :  { %v310_v44 = vsub.f32 %v1448_v33, %v306_v36  ;;  %v311_v23 = vsub.f32 %v1450_v34, %v307_v37  ;;  %v304_v45 = vmul.f32 2.0, %v300_v57  ;;  %v357_v46 = vmul.f32 %v344_v24, %v337_v38 }
 0x22f   :  { %v356_v55 = vrot.slane %v223_v29, %v1398_v43  ;;  %v400_v20 = vrot.slane %v223_v29, %v1432_v17 }
 0x230   :  { %v308_v30 = vmul.f32 %v304_v45, %v1461_v41  ;;  %v361_v47 = vsel %vm244_vm9, %v357_v46, 0.0  ;;  %v338_v48 = vmul.f32 %v929_v39, %v310_v44  ;;  %v339_v49 = vmul.f32 %v930_v42, %v311_v23 }
 0x231   :  { %362 = vadd.xlane.f32.xlu0 %v361_v47 }
 0x232   :  { %v312_v33 = vsub.f32 %v1458_v40, %v308_v30  ;;  %v358_v51 = vmul.f32 %v348_v1, %v338_v48  ;;  %v359_v34 = vmul.f32 %v352_v2, %v339_v49 }
 0x234   :  { %v364_v52 = vsel %vm244_vm9, %v358_v51, 0.0  ;;  %v367_v53 = vsel %vm244_vm9, %v359_v34, 0.0  ;;  %v340_v54 = vmul.f32 %v931_v50, %v312_v33 }
 0x235   :  { %365 = vadd.xlane.f32.xlu1 %v364_v52  ;;  %368 = vadd.xlane.f32.xlu0 %v367_v53 }
 0x236   :  { %v360_v9 = vmul.f32 %v356_v55, %v340_v54 }
 0x238   :  { %v370_v41 = vsel %vm244_vm9, %v360_v9, 0.0 }
 0x239   :  { %371 = vadd.xlane.f32.xlu1 %v370_v41 }
 0x2be   :  { %v363_v56 = vpop.xlane.xlu0 %362 }
 0x2bf   :  { %v373_v58 = vmul.f32 2.0, %v363_v56 }
 0x2c1   :  { %v377_v59 = vmul.f32 %v373_v58, %v344_v24 }
 0x2c2   :  { %v366_v60 = vpop.xlane.xlu1 %365  ;;  %v369_v40 = vpop.xlane.xlu0 %368 }
 0x2c3   :  { %v374_v61 = vmul.f32 2.0, %v366_v60  ;;  %v375_v62 = vmul.f32 2.0, %v369_v40  ;;  %v1486_v63 = vsub.f32 %v337_v38, %v377_v59 }
 0x2c5   :  { %v378_v3 = vmul.f32 %v374_v61, %v348_v1  ;;  %v379_v4 = vmul.f32 %v375_v62, %v352_v2  ;;  %v401_v43 = vmul.f32 %v388_v0, %v1486_v63 }
 0x2c6   :  { %v372_v5 = vpop.xlane.xlu1 %371 }
 0x2c7   :  { %v376_v8 = vmul.f32 2.0, %v372_v5  ;;  %v405_v10 = vsel %vm244_vm9, %v401_v43, 0.0  ;;  %v1493_v11 = vsub.f32 %v338_v48, %v378_v3  ;;  %v1495_v12 = vsub.f32 %v339_v49, %v379_v4 }
 0x2c8   :  { %406 = vadd.xlane.f32.xlu0 %v405_v10 }
 0x2c9   :  { %v380_v13 = vmul.f32 %v376_v8, %v356_v55  ;;  %v402_v14 = vmul.f32 %v392_v6, %v1493_v11  ;;  %v403_v15 = vmul.f32 %v396_v7, %v1495_v12 }
 0x2cb   :  { %v408_v16 = vsel %vm244_vm9, %v402_v14, 0.0  ;;  %v411_v18 = vsel %vm244_vm9, %v403_v15, 0.0  ;;  %v1501_v19 = vsub.f32 %v340_v54, %v380_v13 }
 0x2cc   :  { %409 = vadd.xlane.f32.xlu1 %v408_v16  ;;  %412 = vadd.xlane.f32.xlu0 %v411_v18 }
 0x2cd   :  { %v404_v21 = vmul.f32 %v400_v20, %v1501_v19 }
 0x2cf   :  { %v414_v22 = vsel %vm244_vm9, %v404_v21, 0.0 }
 0x2d0   :  { %415 = vadd.xlane.f32.xlu1 %v414_v22 }
 0x2d1   :  { %1228 = shalt.err (!%p1225_p6)  }
 0x2d2   :  { %s1229_s0 = scalar_lea.vmem %s92_s30, 512  ;;  %p1234_p8 = scmp.lt.s32.totalorder %s92_s30, %s92_s30 }
 0x2d3   :  { %p1230_p7 = scmp.ne.s32.totalorder %s92_s30, %s1229_s0  ;;  %p1235_p9 = scmp.lt.s32.totalorder %s1229_s0, %s1229_s0 }
 0x2d5   :  { %p1236_p10 = por %p1235_p9, %p1234_p8 }
 0x2d7   :  { %p1237_p11 = pnand %p1236_p10, %p1230_p7 }
 0x2d9   :  { %1240 = shalt.err (!%p1237_p11)  }
 0x2da   :  { %94 = dma.hbm_to_vmem [thread:$0]  %s1616_s6, 512, %s92_s30, [#allocation4] }
 0x355   :  { %v407_v17 = vpop.xlane.xlu0 %406 }
 0x356   :  { %v417_v25 = vmul.f32 2.0, %v407_v17 }
 0x358   :  { %v421_v26 = vmul.f32 %v417_v25, %v388_v0 }
 0x359   :  { %v410_v27 = vpop.xlane.xlu1 %409  ;;  %v413_v28 = vpop.xlane.xlu0 %412 }
 0x35a   :  { %v425_v31 = vsub.f32 %v1486_v63, %v421_v26  ;;  %v418_v32 = vmul.f32 2.0, %v410_v27  ;;  %v419_v35 = vmul.f32 2.0, %v413_v28 }
 0x35c   :  { %v422_v36 = vmul.f32 %v418_v32, %v392_v6  ;;  %v423_v37 = vmul.f32 %v419_v35, %v396_v7 }
 0x35d   :  { %v416_v38 = vpop.xlane.xlu1 %415 }
 0x35e   :  { %v426_v24 = vsub.f32 %v1493_v11, %v422_v36  ;;  %v427_v57 = vsub.f32 %v1495_v12, %v423_v37  ;;  %v420_v39 = vmul.f32 2.0, %v416_v38 }
 0x360   :  { %v424_v42 = vmul.f32 %v420_v39, %v400_v20 }
 0x362   :  { %v428_v44 = vsub.f32 %v1501_v19, %v424_v42 }
 0x363   :  { %1269 = dma.done.wait [#allocation4], 512 }
 0x364   :  { %1270 = vsyncadd [#allocation4], 4294966784  ;;  %v1284_v23 = vmov 0.0   ;;  %vm1285_vm2 = vmmov 0   ;;  %v433_v45 = vld [vmem:[#allocation3] sm:$0xff]  ;;  %v434_v46 = vld [vmem:[#allocation3 + $0x8] sm:$0xff] }
 0x365   :  { %982 = vmatprep.subr.mxu1 %v1284_v23  ;;  %984 = vmatprep.mubr.msk.f32.mxu1 %vm1285_vm2, %v1284_v23  ;;  %v435_v1 = vld [vmem:[#allocation3 + $0x10] sm:$0xff]  ;;  %v436_v2 = vld [vmem:[#allocation3 + $0x18] sm:$0xff]  ;;  %vm729_vm3 = vcmask 261120   ;;  %v746_v29 = vld [vmem:[%s1615_s5] sm:$0xff]  ;;  %s1286_s22 = smov [#allocation13]  }
 0x366   :  { %983 = vmatpush3.msra.mxu1 %v433_v45  ;;  %730 = vst.msk [vmem:[#allocation2 + $0x20] sm:$0xff] %vm729_vm3, %v1284_v23  ;;  %731 = vst.msk [vmem:[#allocation2 + $0x28] sm:$0xff] %vm729_vm3, %v1284_v23  ;;  %1034 = vmatprep.mubr.msk.f32.mxu0 %vm729_vm3, %v746_v29  ;;  %v747_v13 = vld [vmem:[%s1615_s5 + $0x8] sm:$0xff]  ;;  %v936_v14 = vld [vmem:[%s1614_s4] ss:$0 sm:$0xff]  ;;  %s908_s23 = sshll.u32 %s1286_s22, 4  ;;  %s909_s23 = int_to_ptr.vmem [resolvable:$true] %s908_s23 }
 0x367   :  { %985 = vmatmul.mubr.msk.f32.vlgmr.msra.gmra.mrb[0].mxu1 %vm244_vm9, %v425_v31  ;;  %987 = vmatprep.subr.mxu1 %v1284_v23  ;;  %732 = vst.msk [vmem:[#allocation2 + $0x30] sm:$0xff] %vm729_vm3, %v1284_v23  ;;  %733 = vst.msk [vmem:[#allocation2 + $0x38] sm:$0xff] %vm729_vm3, %v1284_v23  ;;  %s1241_s24 = scalar_lea.vmem %s909_s23, 256  ;;  %p1246_p13 = scmp.lt.s32.totalorder %s909_s23, %s909_s23 }
 0x368   :  { %988 = vmatpush3.msra.mxu1 %v434_v46  ;;  %989 = vmatprep.mubr.msk.f32.mxu1 %vm1285_vm2, %v1284_v23  ;;  %734 = vst.msk [vmem:[#allocation2 + $0x40] sm:$0xff] %vm729_vm3, %v1284_v23  ;;  %735 = vst.msk [vmem:[#allocation2 + $0x48] sm:$0xff] %vm729_vm3, %v1284_v23  ;;  %p1242_p12 = scmp.ne.s32.totalorder %s909_s23, %s1241_s24  ;;  %p1247_p0 = scmp.lt.s32.totalorder %s1241_s24, %s1241_s24 }
 0x369   :  { %992 = vmatprep.subr.mxu1 %v1284_v23  ;;  %736 = vst.msk [vmem:[#allocation2 + $0x50] sm:$0xff] %vm729_vm3, %v1284_v23  ;;  %737 = vst.msk [vmem:[#allocation2 + $0x58] sm:$0xff] %vm729_vm3, %v1284_v23 }
 0x36a   :  { %738 = vst.msk [vmem:[#allocation2 + $0x60] sm:$0xff] %vm729_vm3, %v1284_v23  ;;  %739 = vst.msk [vmem:[#allocation2 + $0x68] sm:$0xff] %vm729_vm3, %v1284_v23  ;;  %p1248_p1 = por %p1247_p0, %p1246_p13 }
 0x36b   :  { %990 = vmatmul.mubr.msk.f32.vlgmr.msra.gmra.mrb[2].mxu1 %vm244_vm9, %v426_v24  ;;  %740 = vst.msk [vmem:[#allocation2 + $0x70] sm:$0xff] %vm729_vm3, %v1284_v23  ;;  %741 = vst.msk [vmem:[#allocation2 + $0x78] sm:$0xff] %vm729_vm3, %v1284_v23 }
 0x36c   :  { %993 = vmatpush3.msra.mxu1 %v435_v1  ;;  %994 = vmatprep.mubr.msk.f32.mxu1 %vm1285_vm2, %v1284_v23  ;;  %vm1551_vm4 = vmpackc.low %vm729_vm3, %vm729_vm3  ;;  %p1249_p2 = pnand %p1248_p1, %p1242_p12 }
 0x36d   :  { %997 = vmatprep.subr.mxu1 %v1284_v23  ;;  %v752_v9 = vld [vmem:[#allocation2 + $0x20] sm:$0xff]  ;;  %v753_v41 = vld [vmem:[#allocation2 + $0x28] sm:$0xff] }
 0x36e   :  { %v1049_v60 = vpack.c.bf16 %v753_v41, %v752_v9  ;;  %v754_v40 = vld [vmem:[#allocation2 + $0x30] sm:$0xff]  ;;  %v755_v61 = vld [vmem:[#allocation2 + $0x38] sm:$0xff] }
 0x36f   :  { %995 = vmatmul.mubr.msk.f32.vlgmr.msra.gmra.mrb[4].mxu1 %vm244_vm9, %v427_v57  ;;  %v1055_v62 = vpack.c.bf16 %v755_v61, %v754_v40  ;;  %v756_v63 = vld [vmem:[#allocation2 + $0x40] sm:$0xff]  ;;  %v757_v0 = vld [vmem:[#allocation2 + $0x48] sm:$0xff] }
 0x370   :  { %998 = vmatpush3.msra.mxu1 %v436_v2  ;;  %999 = vmatprep.mubr.msk.f32.mxu1 %vm1285_vm2, %v1284_v23  ;;  %v1061_v3 = vpack.c.bf16 %v757_v0, %v756_v63  ;;  %v758_v4 = vld [vmem:[#allocation2 + $0x50] sm:$0xff]  ;;  %v759_v43 = vld [vmem:[#allocation2 + $0x58] sm:$0xff] }
 0x371   :  { %v1067_v5 = vpack.c.bf16 %v759_v43, %v758_v4  ;;  %v760_v6 = vld [vmem:[#allocation2 + $0x60] sm:$0xff]  ;;  %v761_v7 = vld [vmem:[#allocation2 + $0x68] sm:$0xff] }
 0x372   :  { %v1073_v8 = vpack.c.bf16 %v761_v7, %v760_v6  ;;  %v762_v10 = vld [vmem:[#allocation2 + $0x70] sm:$0xff]  ;;  %v763_v11 = vld [vmem:[#allocation2 + $0x78] sm:$0xff] }
 0x373   :  { %1000 = vmatmul.mubr.msk.f32.vlgmr.msra.gmra.mrb[6].mxu1 %vm244_vm9, %v428_v44  ;;  %v1079_v12 = vpack.c.bf16 %v763_v11, %v762_v10 }
 0x43a   :  { %v506_v30 = vpop.f32.mrb[0].mxu1 }
 0x43b   :  { %742 = vst.msk [vmem:[#allocation2] sm:$0xff] %vm729_vm3, %v506_v30  ;;  %v986_v47 = vpop.f32.mrb[1].mxu1 }
 0x43e   :  { %v579_v48 = vpop.f32.mrb[2].mxu1 }
 0x43f   :  { %743 = vst.msk [vmem:[#allocation2 + $0x8] sm:$0xff] %vm729_vm3, %v579_v48  ;;  %v991_v49 = vpop.f32.mrb[3].mxu1 }
 0x442   :  { %v652_v50 = vpop.f32.mrb[4].mxu1  ;;  %v748_v34 = vld [vmem:[#allocation2] sm:$0xff] }
 0x443   :  { %744 = vst.msk [vmem:[#allocation2 + $0x10] sm:$0xff] %vm729_vm3, %v652_v50  ;;  %v996_v33 = vpop.f32.mrb[5].mxu1 }
 0x446   :  { %v725_v51 = vpop.f32.mrb[6].mxu1  ;;  %v749_v52 = vld [vmem:[#allocation2 + $0x8] sm:$0xff] }
 0x447   :  { %745 = vst.msk [vmem:[#allocation2 + $0x18] sm:$0xff] %vm729_vm3, %v725_v51  ;;  %v1001_v54 = vpop.f32.mrb[7].mxu1  ;;  %v1037_v55 = vpack.c.bf16 %v749_v52, %v748_v34 }
 0x449   :  { %1039 = vmatprep.subr.msk.bf16.mxu0 %vm1551_vm4, %v1037_v55 }
 0x44a   :  { %1042 = vmatpush3.bf16.xpose.msk.msra.mxu0 %vm1551_vm4, %v1037_v55  ;;  %v750_v56 = vld [vmem:[#allocation2 + $0x10] sm:$0xff] }
 0x44e   :  { %v751_v58 = vld [vmem:[#allocation2 + $0x18] sm:$0xff] }
 0x44f   :  { %v1043_v59 = vpack.c.bf16 %v751_v58, %v750_v56 }
 0x451   :  { %1045 = vmatprep.subr.msk.bf16.mxu0 %vm1551_vm4, %v1043_v59 }
 0x452   :  { %1048 = vmatpush3.bf16.xpose.msk.msra.mxu0 %vm1551_vm4, %v1043_v59 }
 0x453   :  { %1051 = vmatprep.subr.msk.bf16.mxu0 %vm1551_vm4, %v1049_v60 }
 0x45a   :  { %1054 = vmatpush3.bf16.xpose.msk.msra.mxu0 %vm1551_vm4, %v1049_v60 }
 0x45b   :  { %1057 = vmatprep.subr.msk.bf16.mxu0 %vm1551_vm4, %v1055_v62 }
 0x462   :  { %1060 = vmatpush3.bf16.xpose.msk.msra.mxu0 %vm1551_vm4, %v1055_v62 }
 0x463   :  { %1063 = vmatprep.subr.msk.bf16.mxu0 %vm1551_vm4, %v1061_v3 }
 0x46a   :  { %1066 = vmatpush3.bf16.xpose.msk.msra.mxu0 %vm1551_vm4, %v1061_v3 }
 0x46b   :  { %1069 = vmatprep.subr.msk.bf16.mxu0 %vm1551_vm4, %v1067_v5 }
 0x472   :  { %1072 = vmatpush3.bf16.xpose.msk.msra.mxu0 %vm1551_vm4, %v1067_v5 }
 0x473   :  { %1075 = vmatprep.subr.msk.bf16.mxu0 %vm1551_vm4, %v1073_v8 }
 0x47a   :  { %1078 = vmatpush3.bf16.xpose.msk.msra.mxu0 %vm1551_vm4, %v1073_v8 }
 0x47b   :  { %1081 = vmatprep.subr.msk.bf16.mxu0 %vm1551_vm4, %v1079_v12 }
 0x482   :  { %1084 = vmatpush3.bf16.xpose.msk.msra.mxu0 %vm1551_vm4, %v1079_v12 }
 0x489   :  { %1035 = vmatmul.mubr.msk.f32.vlgmr.msra.gmra.mrb[0].mxu0 %vm729_vm3, %v747_v13 }
 0x55c   :  { %v1036_v15 = vpop.f32.mrb[0].mxu0 }
 0x55d   :  { %v898_v16 = vadd.f32 %v1036_v15, %v936_v14  ;;  %v892_v18 = vpop.f32.mrb[1].mxu0 }
 0x55e   :  { %v893_v19 = vadd.f32 %v936_v14, %v892_v18 }
 0x55f   :  { %902 = vst [vmem:[#allocation13 + $0x8] sm:$0xff] %v898_v16 }
 0x560   :  { %901 = vst [vmem:[#allocation13] sm:$0xff] %v893_v19 }
 0x561   :  { %1252 = shalt.err (!%p1249_p2)
}
 0x562   :  { %s1253_s4 = scalar_lea.hbm %s1617_s7, 256 }
 0x563   :  { %p1254_p3 = scmp.ne.s32.totalorder %s1617_s7, %s1253_s4  ;;  %p1257_p4 = scmp.lt.u32.totalorder %s1253_s4, %s1617_s7 }
 0x565   :  { %p1259_p5 = pnand %p1257_p4, %p1254_p3 }
 0x567   :  { %1262 = shalt.err (!%p1259_p5)
}
 0x568   :  { %914 = dma.vmem_to_hbm [thread:$0]  %s909_s23, 256, %s1617_s7, [#allocation7], %s1277_s1, %s1277_s1, %s1278_s25  }
 0x569   :  { %1271 = dma.done.wait [#allocation7], 256  }
 0x56a   :  { %1272 = vsyncadd [#allocation7], 4294967040 }
 0x56b   :  { %918 = vsyncpa [#allocation6], 1 }
 0x56c   :  { %919 = vsyncpa [#allocation9], 1 }
 0x56d   :  { %920 = vsyncpa [#allocation12], 1 }
 0x56e   :  { %921 = vsyncpa [#allocation7], 1 }
 0x56f   :  { %922 = vsyncmov [#allocation4] }
 0x572   :  { %s923_s8 = vpop.sfrf %922 }
 0x573   :  { %p955_p6 = scmp.ne.s32.totalorder %s923_s8, 0 }
 0x575   :  { %927 = shalt.err (%p955_p6)  }

</bundles_post_ra>
